<compile_context>
chip_gen: v6e
topology: v6e:2x2x1
jax: 0.10.0
libtpu: 0.0.40
codegen_flags: <defaults>
</compile_context>

<pallas_src>
import math
import jax
import jax.numpy as jnp
from jax.experimental import pallas as pl
from jax.experimental.pallas import tpu as pltpu


def _round_up(x, m):
    return ((x + m - 1) // m) * m


def mlp_kernel(x_ref, w1_ref, b1_ref, w2_ref, b2_ref, o_ref):
    # x:  [TB, Dp] bf16   w1: [Dp, Hp] bf16   b1: [1, Hp] f32
    # w2: [Hp, Op] bf16   b2: [1, Op] f32     o:  [TB, Op] f32
    h = jnp.dot(x_ref[...], w1_ref[...],
                preferred_element_type=jnp.float32) + b1_ref[...]
    y = jnp.dot(h.astype(w2_ref.dtype), w2_ref[...],
                preferred_element_type=jnp.float32) + b2_ref[...]
    o_ref[...] = y.astype(o_ref.dtype)


def prepare_mlp_params(w1, b1, w2, b2, output_dims):
    """One-time (model-load) prep of PyTorch-layout Linear params.

    w1: [hidden, input_dim], b1: [hidden]
    w2: [out_total, hidden], b2: [out_total]
    Returns a dict of padded, transposed, bf16-cast weights + size metadata.
    """
    H, D = w1.shape
    O = w2.shape[0]
    assert w2.shape[1] == H and sum(output_dims) == O

    Dp = _round_up(max(D, 128), 128)
    Hp = _round_up(max(H, 128), 128)
    Op = _round_up(max(O, 128), 128)

    w1p = (jnp.zeros((Dp, Hp), jnp.float32).at[:D, :H].set(w1.T)
           .astype(jnp.bfloat16))
    b1p = jnp.zeros((1, Hp), jnp.float32).at[0, :H].set(b1)
    w2p = (jnp.zeros((Hp, Op), jnp.float32).at[:H, :O].set(w2.T)
           .astype(jnp.bfloat16))
    b2p = jnp.zeros((1, Op), jnp.float32).at[0, :O].set(b2)

    return dict(w1p=w1p, b1p=b1p, w2p=w2p, b2p=b2p,
                D=D, H=H, O=O, Dp=Dp, Hp=Hp, Op=Op,
                output_dims=tuple(int(d) for d in output_dims))


def mlp_predictor_forward(params, x):
    """Equivalent of MLPPredictor.forward; returns tuple split per output_dims."""
    B, D = x.shape
    assert D == params["D"]
    Dp, Hp, Op = params["Dp"], params["Hp"], params["Op"]
    O = params["O"]
    output_dims = params["output_dims"]

    # Batch tiling: keep weights resident, pipeline x/o tiles across the grid.
    B8 = _round_up(max(B, 8), 8)
    TB = 256 if B8 >= 256 else B8
    Bp = _round_up(B8, TB)

    # Per-call: only pad + cast the activation.
    xp = jnp.pad(x.astype(jnp.bfloat16), ((0, Bp - B), (0, Dp - D)))

    # VMEM budget: bf16 weights (double-buffered by default) + f32 biases +
    # double-buffered bf16 x tile / f32 o tile, plus headroom.
    weight_bytes = (Dp * Hp + Hp * Op) * 2
    bias_bytes = (Hp + Op) * 4
    io_bytes = 2 * (TB * Dp * 2 + TB * Op * 4)
    vmem_limit = int(min(128 * 1024 * 1024,
                         max(32 * 1024 * 1024,
                             2 * weight_bytes + 2 * bias_bytes + io_bytes
                             + (8 << 20))))

    H = params["H"]
    cost = pl.CostEstimate(
        flops=2 * B * (D * H + H * O),
        transcendentals=0,
        bytes_accessed=(Bp * Dp * 2 + Dp * Hp * 2 + Hp * Op * 2
                        + Hp * 4 + Op * 4 + Bp * Op * 4),
    )

    out = pl.pallas_call(
        mlp_kernel,
        out_shape=jax.ShapeDtypeStruct((Bp, Op), jnp.float32),
        grid=(Bp // TB,),
        in_specs=[
            pl.BlockSpec((TB, Dp), lambda i: (i, 0)),   # x tile, marches with grid
            pl.BlockSpec((Dp, Hp), lambda i: (0, 0)),   # w1, resident
            pl.BlockSpec((1, Hp), lambda i: (0, 0)),    # b1, resident
            pl.BlockSpec((Hp, Op), lambda i: (0, 0)),   # w2, resident
            pl.BlockSpec((1, Op), lambda i: (0, 0)),    # b2, resident
        ],
        out_specs=pl.BlockSpec((TB, Op), lambda i: (i, 0)),
        compiler_params=pltpu.CompilerParams(
            dimension_semantics=("parallel",),
            vmem_limit_bytes=vmem_limit),
        cost_estimate=cost,
    )(xp, params["w1p"], params["b1p"], params["w2p"], params["b2p"])

    y = out[:B, :O]
    # torch.split(x, output_dims, dim=1) — cheap static slices outside kernel.
    pieces = []
    start = 0
    for d in output_dims:
        pieces.append(y[:, start:start + d])
        start += d
    return tuple(pieces)


def init_linear_params(key, in_features, out_features):
    """Deterministic PyTorch-style nn.Linear init: U(-1/sqrt(in), +1/sqrt(in))."""
    kw, kb = jax.random.split(key)
    bound = 1.0 / math.sqrt(in_features)
    w = jax.random.uniform(kw, (out_features, in_features), jnp.float32,
                           minval=-bound, maxval=bound)
    b = jax.random.uniform(kb, (out_features,), jnp.float32,
                           minval=-bound, maxval=bound)
    return w, b


if __name__ == "__main__":
    # Small shapes consistent with MLPPredictor(input_dim=100, hidden_dim=128,
    # output_dims=[1, 3]).
    batch = 4
    input_dim = 100
    hidden_dim = 128
    output_dims = [1, 3]

    key = jax.random.PRNGKey(0)
    kx, k1, k2 = jax.random.split(key, 3)

    x = jax.random.normal(kx, (batch, input_dim), jnp.float32)
    w1, b1 = init_linear_params(k1, input_dim, hidden_dim)
    w2, b2 = init_linear_params(k2, hidden_dim, sum(output_dims))

    params = prepare_mlp_params(w1, b1, w2, b2, output_dims)
    outs = mlp_predictor_forward(params, x)
    outs = jax.block_until_ready(outs)

    # Plain-JAX reference with the same bf16 operand quantization / f32 accum.
    xb = x.astype(jnp.bfloat16)
    h_ref = jnp.dot(xb, w1.astype(jnp.bfloat16).T,
                    preferred_element_type=jnp.float32) + b1
    y_ref = jnp.dot(h_ref.astype(jnp.bfloat16), w2.astype(jnp.bfloat16).T,
                    preferred_element_type=jnp.float32) + b2

    start = 0
    ok = True
    for d, o in zip(output_dims, outs):
        ref_piece = y_ref[:, start:start + d]
        start += d
        ok = ok and o.shape == ref_piece.shape
        ok = ok and bool(jnp.allclose(o, ref_piece, atol=5e-3, rtol=5e-3))
    assert ok, "Pallas kernel output mismatch vs JAX reference"

    print("KERNEL_OK")
</pallas_src>

<mosaic_0001>
module attributes {stable_mosaic.version = 11 : i64} {
  func.func @mlp_kernel(%arg0: i32, %arg1: memref<8x128xbf16, #tpu.memory_space<vmem>>, %arg2: memref<128x128xbf16, #tpu.memory_space<vmem>>, %arg3: memref<1x128xf32, #tpu.memory_space<vmem>>, %arg4: memref<128x128xbf16, #tpu.memory_space<vmem>>, %arg5: memref<1x128xf32, #tpu.memory_space<vmem>>, %arg6: memref<8x128xf32, #tpu.memory_space<vmem>>) attributes {dimension_semantics = [#tpu.dimension_semantics<parallel>], iteration_bounds = array<i64: 1>, scalar_prefetch = 0 : i64, scratch_operands = 0 : i64, tpu.core_type = #tpu.core_type<tc>, window_params = [{transform_indices = @transform_0, window_bounds = array<i64: 8, 128>}, {pipeline_mode = #tpu.pipeline_mode<synchronous>, transform_indices = @transform_1, window_bounds = array<i64: 128, 128>}, {pipeline_mode = #tpu.pipeline_mode<synchronous>, transform_indices = @transform_2, window_bounds = array<i64: 1, 128>}, {pipeline_mode = #tpu.pipeline_mode<synchronous>, transform_indices = @transform_3, window_bounds = array<i64: 128, 128>}, {pipeline_mode = #tpu.pipeline_mode<synchronous>, transform_indices = @transform_4, window_bounds = array<i64: 1, 128>}, {transform_indices = @transform_5, window_bounds = array<i64: 8, 128>}]} {
    %c0 = arith.constant 0 : index
    %c0_0 = arith.constant 0 : index
    %0 = vector.load %arg1[%c0, %c0_0] : memref<8x128xbf16, #tpu.memory_space<vmem>>, vector<8x128xbf16>
    %c0_1 = arith.constant 0 : index
    %c0_2 = arith.constant 0 : index
    %1 = vector.load %arg2[%c0_1, %c0_2] : memref<128x128xbf16, #tpu.memory_space<vmem>>, vector<128x128xbf16>
    %cst = arith.constant dense<0.000000e+00> : vector<8x128xf32>
    %2 = tpu.matmul %0, %1, %cst {dimension_numbers = #tpu.dot_dimension_numbers<[1], [0], [0], [1], [0, 0, 1, 1], [], []>} : vector<8x128xbf16>, vector<128x128xbf16>, vector<8x128xf32> -> vector<8x128xf32>
    %c0_3 = arith.constant 0 : index
    %c0_4 = arith.constant 0 : index
    %3 = vector.load %arg3[%c0_3, %c0_4] : memref<1x128xf32, #tpu.memory_space<vmem>>, vector<1x128xf32>
    %4 = vector.broadcast %3 : vector<1x128xf32> to vector<8x128xf32>
    %5 = arith.addf %2, %4 : vector<8x128xf32>
    %6 = arith.truncf %5 : vector<8x128xf32> to vector<8x128xbf16>
    %c0_5 = arith.constant 0 : index
    %c0_6 = arith.constant 0 : index
    %7 = vector.load %arg4[%c0_5, %c0_6] : memref<128x128xbf16, #tpu.memory_space<vmem>>, vector<128x128xbf16>
    %cst_7 = arith.constant dense<0.000000e+00> : vector<8x128xf32>
    %8 = tpu.matmul %6, %7, %cst_7 {dimension_numbers = #tpu.dot_dimension_numbers<[1], [0], [0], [1], [0, 0, 1, 1], [], []>} : vector<8x128xbf16>, vector<128x128xbf16>, vector<8x128xf32> -> vector<8x128xf32>
    %c0_8 = arith.constant 0 : index
    %c0_9 = arith.constant 0 : index
    %9 = vector.load %arg5[%c0_8, %c0_9] : memref<1x128xf32, #tpu.memory_space<vmem>>, vector<1x128xf32>
    %10 = vector.broadcast %9 : vector<1x128xf32> to vector<8x128xf32>
    %11 = arith.addf %8, %10 : vector<8x128xf32>
    %c0_10 = arith.constant 0 : index
    %c0_11 = arith.constant 0 : index
    %12 = vector.load %arg6[%c0_10, %c0_11] : memref<8x128xf32, #tpu.memory_space<vmem>>, vector<8x128xf32>
    tpu.vector_store %arg6[%c0_10, %c0_11], %11 {strides = array<i32>} : memref<8x128xf32, #tpu.memory_space<vmem>>, vector<8x128xf32>,
    return
  }
  func.func @transform_0(%arg0: i32) -> (i32, i32) {
    %c0_i32 = arith.constant 0 : i32
    %c0_i32_0 = arith.constant 0 : i32
    return %arg0, %c0_i32 : i32, i32
  }
  func.func @transform_1(%arg0: i32) -> (i32, i32) {
    %c0_i32 = arith.constant 0 : i32
    %c0_i32_0 = arith.constant 0 : i32
    %c0_i32_1 = arith.constant 0 : i32
    return %c0_i32, %c0_i32_0 : i32, i32
  }
  func.func @transform_2(%arg0: i32) -> (i32, i32) {
    %c0_i32 = arith.constant 0 : i32
    %c0_i32_0 = arith.constant 0 : i32
    %c0_i32_1 = arith.constant 0 : i32
    return %c0_i32, %c0_i32_0 : i32, i32
  }
  func.func @transform_3(%arg0: i32) -> (i32, i32) {
    %c0_i32 = arith.constant 0 : i32
    %c0_i32_0 = arith.constant 0 : i32
    %c0_i32_1 = arith.constant 0 : i32
    return %c0_i32, %c0_i32_0 : i32, i32
  }
  func.func @transform_4(%arg0: i32) -> (i32, i32) {
    %c0_i32 = arith.constant 0 : i32
    %c0_i32_0 = arith.constant 0 : i32
    %c0_i32_1 = arith.constant 0 : i32
    return %c0_i32, %c0_i32_0 : i32, i32
  }
  func.func @transform_5(%arg0: i32) -> (i32, i32) {
    %c0_i32 = arith.constant 0 : i32
    %c0_i32_0 = arith.constant 0 : i32
    return %arg0, %c0_i32 : i32, i32
  }
}

</mosaic_0001>

<bundles_post_ra>
// kernel: tpu_custom_call.1
= control target key start
LH: loop header
LB: loop body
LE: loop exit
PB: predicated region body
PF: predicated region fallthrough
CT: control target
= control target key end

     0   :  { %10 = vsyncpa [#allocation3], 0  ;;  %s544_s0 = inlined_call_operand.hbm [shape: bf16[8,128], index: 0, kind: input, shape index: {}]   ;;  %s545_s1 = inlined_call_operand.hbm [shape: bf16[128,128], index: 1, kind: input, shape index: {}]   ;;  %s546_s2 = inlined_call_operand.vmem [shape: f32[1,128], index: 2, kind: input, shape index: {}]   ;;  %s547_s3 = inlined_call_operand.hbm [shape: bf16[128,128], index: 3, kind: input, shape index: {}]   ;;  %s548_s4 = inlined_call_operand.vmem [shape: f32[1,128], index: 4, kind: input, shape index: {}]   ;;  %s549_s5 = inlined_call_operand.hbm [shape: f32[8,128], index: 5, kind: output, shape index: {}]  }
   0x1   :  { %11 = vsyncpa [#allocation6], 0 }
   0x2   :  { %12 = vsyncpa [#allocation4], 0  ;;  %s488_s18 = smov [#allocation5]  }
   0x3   :  { %s28_s19 = sshll.u32 %s488_s18, 4  ;;  %s29_s19 = int_to_ptr.vmem [resolvable:$true] %s28_s19 }
   0x4   :  { %s410_s20 = scalar_lea.vmem %s29_s19, 1024  ;;  %p415_p1 = scmp.lt.s32.totalorder %s29_s19, %s29_s19 }
   0x5   :  { %p411_p0 = scmp.ne.s32.totalorder %s29_s19, %s410_s20  ;;  %p416_p2 = scmp.lt.s32.totalorder %s410_s20, %s410_s20 }
   0x7   :  { %p417_p3 = por %p416_p2, %p415_p1 }
   0x9   :  { %p418_p4 = pnand %p417_p3, %p411_p0 }
   0xb   :  { %421 = shalt.err (!%p418_p4)
}
   0xc   :  { %s489_s21 = smov 64   ;;  %s490_s22 = smov 4  }
   0xd   :  { %34 = dma.hbm_to_vmem [thread:$0]  %s545_s1, 1024, %s29_s19, [#allocation6], %s489_s21, %s489_s21, %s490_s22  }
   0xe   :  { %s491_s25 = smov [#allocation2]   ;;  %s492_s27 = smov [#allocation7]  }
   0xf   :  { %s19_s26 = sshll.u32 %s491_s25, 4  ;;  %s42_s28 = sshll.u32 %s492_s27, 4  ;;  %s20_s26 = int_to_ptr.vmem [resolvable:$true] %s19_s26  ;;  %s43_s28 = int_to_ptr.vmem [resolvable:$true] %s42_s28 }
  0x10   :  { %s430_s29 = scalar_lea.vmem %s20_s26, 64  ;;  %p435_p6 = scmp.lt.s32.totalorder %s20_s26, %s20_s26 }
  0x11   :  { %p431_p5 = scmp.ne.s32.totalorder %s20_s26, %s430_s29  ;;  %p436_p7 = scmp.lt.s32.totalorder %s430_s29, %s430_s29 }
  0x13   :  { %p437_p8 = por %p436_p7, %p435_p6 }
  0x15   :  { %p438_p9 = pnand %p437_p8, %p431_p5 }
  0x17   :  { %441 = shalt.err (!%p438_p9)
}
  0x18   :  { %22 = dma.hbm_to_vmem [thread:$0]  %s544_s0, 64, %s20_s26, [#allocation3]  }
  0x19   :  { %s450_s7 = scalar_lea.vmem %s43_s28, 1024  ;;  %p455_p11 = scmp.lt.s32.totalorder %s43_s28, %s43_s28 }
  0x1a   :  { %p451_p10 = scmp.ne.s32.totalorder %s43_s28, %s450_s7  ;;  %p456_p12 = scmp.lt.s32.totalorder %s450_s7, %s450_s7 }
  0x1c   :  { %p457_p13 = por %p456_p12, %p455_p11 }
  0x1e   :  { %p458_p0 = pnand %p457_p13, %p451_p10 }
  0x20   :  { %461 = shalt.err (!%p458_p0)
}
  0x21   :  { %48 = dma.hbm_to_vmem [thread:$0]  %s547_s3, 1024, %s43_s28, [#allocation6], %s489_s21, %s489_s21, %s490_s22  }
  0x22   :  { %482 = dma.done.wait [#allocation3], 64  }
  0x23   :  { %483 = vsyncadd [#allocation3], 4294967232 }
  0x24   :  { %484 = dma.done.wait [#allocation6], 2048  }
  0x25   :  { %485 = vsyncadd [#allocation6], 4294965248  ;;  %v493_v0 = vmov 0.0   ;;  %vm494_vm0 = vmmov 0   ;;  %v386_v1 = vld [vmem:[#allocation5 + $0x38] sm:$0xff]   ;;  %v387_v2 = vld [vmem:[#allocation5 + $0x30] sm:$0xff]  }
  0x26   :  { %338 = vmatprep.subr.bf16.mxu0 %v493_v0  ;;  %354 = vmatprep.mubr.msk.bf16.mxu0 %vm494_vm0, %v493_v0  ;;  %v388_v3 = vld [vmem:[#allocation5 + $0x28] sm:$0xff]   ;;  %v394_v4 = vld [vmem:[#allocation7 + $0x38] sm:$0xff]   ;;  %v389_v5 = vld [vmem:[#allocation5 + $0x20] sm:$0xff]   ;;  %s495_s11 = smov [#allocation8]  }
  0x27   :  { %358 = vmatprep.subr.bf16.mxu1 %v493_v0  ;;  %374 = vmatprep.mubr.msk.bf16.mxu1 %vm494_vm0, %v493_v0  ;;  %v395_v6 = vld [vmem:[#allocation7 + $0x30] sm:$0xff]   ;;  %v390_v7 = vld [vmem:[#allocation5 + $0x18] sm:$0xff]   ;;  %v396_v8 = vld [vmem:[#allocation7 + $0x28] sm:$0xff]   ;;  %s292_s12 = sshll.u32 %s495_s11, 4  ;;  %s293_s12 = int_to_ptr.vmem [resolvable:$true] %s292_s12 }
  0x28   :  { %339 = vmatpush3.bf16.msra.mxu0 %v386_v1  ;;  %359 = vmatpush3.bf16.msra.mxu1 %v394_v4  ;;  %v391_v9 = vld [vmem:[#allocation5 + $0x10] sm:$0xff]   ;;  %v397_v10 = vld [vmem:[#allocation7 + $0x20] sm:$0xff]   ;;  %v392_v11 = vld [vmem:[#allocation5 + $0x8] sm:$0xff]   ;;  %p467_p2 = scmp.lt.s32.totalorder %s293_s12, %s293_s12 }
  0x29   :  { %340 = vmatprep.subr.bf16.mxu0 %v493_v0  ;;  %360 = vmatprep.subr.bf16.mxu1 %v493_v0  ;;  %v398_v12 = vld [vmem:[#allocation7 + $0x18] sm:$0xff]   ;;  %v393_v13 = vld [vmem:[#allocation5] sm:$0xff]   ;;  %v399_v14 = vld [vmem:[#allocation7 + $0x10] sm:$0xff]  }
  0x2a   :  { %v61_v15 = vld [vmem:[#allocation2] sm:$0xf]  ;;  %v400_v16 = vld [vmem:[#allocation7 + $0x8] sm:$0xff]   ;;  %v401_v17 = vld [vmem:[#allocation7] sm:$0xff]  }
  0x2b   :  { %v302_v18 = vld [vmem:[%s546_s2] ss:$0 sm:$0xff]  ;;  %s462_s2 = scalar_lea.vmem %s293_s12, 128 }
  0x2c   :  { %341 = vmatpush3.bf16.msra.mxu0 %v387_v2  ;;  %361 = vmatpush3.bf16.msra.mxu1 %v395_v6  ;;  %v311_v25 = vld [vmem:[%s548_s4] ss:$0 sm:$0xff]  ;;  %p463_p1 = scmp.ne.s32.totalorder %s293_s12, %s462_s2  ;;  %p468_p3 = scmp.lt.s32.totalorder %s462_s2, %s462_s2 }
  0x2d   :  { %342 = vmatprep.subr.bf16.mxu0 %v493_v0  ;;  %362 = vmatprep.subr.bf16.mxu1 %v493_v0 }
  0x2e   :  { %p469_p4 = por %p468_p3, %p467_p2 }
  0x30   :  { %343 = vmatpush3.bf16.msra.mxu0 %v388_v3  ;;  %363 = vmatpush3.bf16.msra.mxu1 %v396_v8  ;;  %p470_p5 = pnand %p469_p4, %p463_p1 }
  0x31   :  { %344 = vmatprep.subr.bf16.mxu0 %v493_v0  ;;  %364 = vmatprep.subr.bf16.mxu1 %v493_v0 }
  0x34   :  { %345 = vmatpush3.bf16.msra.mxu0 %v389_v5  ;;  %365 = vmatpush3.bf16.msra.mxu1 %v397_v10 }
  0x35   :  { %346 = vmatprep.subr.bf16.mxu0 %v493_v0  ;;  %366 = vmatprep.subr.bf16.mxu1 %v493_v0 }
  0x38   :  { %347 = vmatpush3.bf16.msra.mxu0 %v390_v7  ;;  %367 = vmatpush3.bf16.msra.mxu1 %v398_v12 }
  0x39   :  { %348 = vmatprep.subr.bf16.mxu0 %v493_v0  ;;  %368 = vmatprep.subr.bf16.mxu1 %v493_v0 }
  0x3c   :  { %349 = vmatpush3.bf16.msra.mxu0 %v391_v9  ;;  %369 = vmatpush3.bf16.msra.mxu1 %v399_v14 }
  0x3d   :  { %350 = vmatprep.subr.bf16.mxu0 %v493_v0  ;;  %370 = vmatprep.subr.bf16.mxu1 %v493_v0 }
  0x40   :  { %351 = vmatpush3.bf16.msra.mxu0 %v392_v11  ;;  %371 = vmatpush3.bf16.msra.mxu1 %v400_v16 }
  0x41   :  { %352 = vmatprep.subr.bf16.mxu0 %v493_v0  ;;  %372 = vmatprep.subr.bf16.mxu1 %v493_v0 }
  0x44   :  { %353 = vmatpush3.bf16.msra.mxu0 %v393_v13  ;;  %373 = vmatpush3.bf16.msra.mxu1 %v401_v17 }
  0x47   :  { %355 = vmatmul.mubr.bf16.vlgmr.msra.gmra.mxu0 %v61_v15 }
 0x107   :  { %v167_v19 = vpop.f32.mrf.mxu0 }
 0x108   :  { %v168_v20 = vadd.f32 %v302_v18, %v167_v19 }
 0x109   :  { %v356_v21 = vpop.f32.mrf.mxu0 }
 0x10a   :  { %v173_v22 = vpack.c.bf16 %v168_v20, %v168_v20 }
 0x10b   :  { %v170_v23 = vpop.f32.mrf.mxu0 }
 0x10c   :  { %375 = vmatmul.mubr.bf16.vlgmr.msra.gmra.mxu1 %v173_v22 }
 0x10d   :  { %v357_v24 = vpop.f32.mrf.mxu0 }
 0x1cc   :  { %v279_v26 = vpop.f32.mrf.mxu1 }
 0x1cd   :  { %v280_v27 = vadd.f32 %v311_v25, %v279_v26 }
 0x1ce   :  { %v376_v28 = vpop.f32.mrf.mxu1 }
 0x1cf   :  { %285 = vst [vmem:[#allocation8] sm:$0xff] %v280_v27 }
 0x1d0   :  { %v282_v29 = vpop.f32.mrf.mxu1 }
 0x1d1   :  { %473 = shalt.err (!%p470_p5)
}
 0x1d2   :  { %295 = dma.vmem_to_hbm [thread:$0]  %s293_s12, 128, %s549_s5, [#allocation4]   ;;  %v377_v30 = vpop.f32.mrf.mxu1 }
 0x1d3   :  { %486 = dma.done.wait [#allocation4], 128  }
 0x1d4   :  { %487 = vsyncadd [#allocation4], 4294967168 }
 0x1d5   :  { %299 = vsyncpa [#allocation3], 1 }
 0x1d6   :  { %300 = vsyncpa [#allocation6], 1 }
 0x1d7   :  { %301 = vsyncpa [#allocation4], 1 }

</bundles_post_ra>
